<compile_context>
chip_gen: v6e
topology: v6e:2x2x1
jax: 0.10.0
libtpu: 0.0.40
codegen_flags: <defaults>
</compile_context>

<pallas_src>
import functools

import jax
import jax.numpy as jnp
from jax.experimental import pallas as pl
from jax.experimental.pallas import tpu as pltpu

LANE = 128
NUM_CORES = 2  # leading "parallel" axis: 2 TCs on v7x, serialized on v5e/v6e


def _mse_kernel(sr_ref, hr_ref, out_ref, acc_ref, *,
                tile_m, m_rows, blocks_per_core, needs_mask):
    c = pl.program_id(0)   # core / parallel axis
    i = pl.program_id(1)   # streaming reduction axis

    @pl.when(i == 0)
    def _():
        acc_ref[...] = jnp.zeros_like(acc_ref)

    d = sr_ref[...].astype(jnp.float32) - hr_ref[...].astype(jnp.float32)
    d2 = d * d

    if needs_mask:
        # Mask rows past the end of the real array (last partial tile and the
        # clamped duplicate tile on the trailing core contribute zero).
        row_start = (c * blocks_per_core + i) * tile_m
        rows_left = m_rows - row_start                      # may be <= 0
        row_ids = jax.lax.broadcasted_iota(jnp.int32, (tile_m, LANE), 0)
        d2 = jnp.where(row_ids < rows_left, d2, 0.0)

    # (tile_m, 128) -> (tile_m//8, 8, 128); summing axis 0 is plain vreg adds
    # (VPU only), keeping the XLU off the per-step critical path.
    acc_ref[...] += jnp.sum(d2.reshape(tile_m // 8, 8, LANE), axis=0)

    @pl.when(i == pl.num_programs(1) - 1)
    def _():
        out_ref[...] = acc_ref[...]


def content_loss(sr: jax.Array, hr: jax.Array, *, tile_m: int = 1024) -> jax.Array:
    """Equivalent to torch.nn.functional.mse_loss(sr, hr) (reduction='mean')."""
    assert sr.shape == hr.shape, "sr and hr must have identical shapes"
    total_n = sr.size
    itemsize = jnp.dtype(sr.dtype).itemsize

    # Flatten to a lane-dense (m_rows, 128) slab, keeping the native dtype.
    flat_sr = sr.reshape(-1)
    flat_hr = hr.reshape(-1)
    lane_pad = (-total_n) % LANE
    if lane_pad:
        # TODO(synk): lane-tail pad copies the inputs; any tensor whose size is
        # a multiple of 128 (typical NCHW feature maps) skips this path.
        flat_sr = jnp.pad(flat_sr, (0, lane_pad))
        flat_hr = jnp.pad(flat_hr, (0, lane_pad))
    m_rows = flat_sr.size // LANE
    sr2d = flat_sr.reshape(m_rows, LANE)
    hr2d = flat_hr.reshape(m_rows, LANE)

    # Sublane granularity depends on dtype packing (8 f32 / 16 bf16 / 32 int8).
    sub = max(8, 32 // itemsize)
    tile_m = pl.cdiv(max(tile_m, sub), sub) * sub           # multiple of sub
    tile_m = min(tile_m, pl.cdiv(m_rows, sub) * sub)        # clamp to array

    total_blocks = pl.cdiv(m_rows, tile_m)
    blocks_per_core = pl.cdiv(total_blocks, NUM_CORES)
    needs_mask = (m_rows % tile_m != 0) or (total_blocks % NUM_CORES != 0)

    def in_map(c, i):
        # Clamp so the trailing core never indexes a fully out-of-bounds
        # block; its extra (duplicate) block is masked to zero in the kernel.
        return (jnp.minimum(c * blocks_per_core + i, total_blocks - 1), 0)

    kernel = functools.partial(
        _mse_kernel,
        tile_m=tile_m,
        m_rows=m_rows,
        blocks_per_core=blocks_per_core,
        needs_mask=needs_mask,
    )

    partials = pl.pallas_call(
        kernel,
        out_shape=jax.ShapeDtypeStruct((NUM_CORES * 8, LANE), jnp.float32),
        grid_spec=pltpu.PrefetchScalarGridSpec(
            num_scalar_prefetch=0,
            grid=(NUM_CORES, blocks_per_core),
            in_specs=[
                pl.BlockSpec((tile_m, LANE), in_map),
                pl.BlockSpec((tile_m, LANE), in_map),
            ],
            out_specs=pl.BlockSpec((8, LANE), lambda c, i: (c, 0)),
            scratch_shapes=[pltpu.VMEM((8, LANE), jnp.float32)],
        ),
        compiler_params=pltpu.CompilerParams(
            dimension_semantics=("parallel", "arbitrary"),
        ),
        cost_estimate=pl.CostEstimate(
            flops=3 * total_n,
            bytes_accessed=2 * total_n * itemsize + NUM_CORES * 8 * LANE * 4,
            transcendentals=0,
        ),
    )(sr2d, hr2d)

    return jnp.sum(partials) / jnp.float32(total_n)


if __name__ == "__main__":
    key = jax.random.PRNGKey(0)
    k1, k2 = jax.random.split(key)
    # Small image-like NCHW tensors, consistent with the module's usage.
    sr = jax.random.normal(k1, (2, 4, 16, 16), dtype=jnp.float32)
    hr = jax.random.normal(k2, (2, 4, 16, 16), dtype=jnp.float32)

    loss = content_loss(sr, hr)
    loss = jax.block_until_ready(loss)

    # Sanity check against a pure-JAX reference (same semantics as F.mse_loss).
    ref = jnp.mean((sr - hr) ** 2)
    assert jnp.allclose(loss, ref, rtol=1e-5, atol=1e-6), (loss, ref)

    print("KERNEL_OK")
</pallas_src>

<mosaic_0001>
module attributes {stable_mosaic.version = 11 : i64} {
  func.func @_mse_kernel(%arg0: i32, %arg1: i32, %arg2: memref<16x128xf32, #tpu.memory_space<vmem>>, %arg3: memref<16x128xf32, #tpu.memory_space<vmem>>, %arg4: memref<8x128xf32, #tpu.memory_space<vmem>>, %arg5: memref<8x128xf32, #tpu.memory_space<vmem>>) attributes {dimension_semantics = [#tpu.dimension_semantics<parallel>, #tpu.dimension_semantics<arbitrary>], iteration_bounds = array<i64: 2, 1>, scalar_prefetch = 0 : i64, scratch_operands = 1 : i64, tpu.core_type = #tpu.core_type<tc>, window_params = [{transform_indices = @transform_0, window_bounds = array<i64: 16, 128>}, {transform_indices = @transform_1, window_bounds = array<i64: 16, 128>}, {transform_indices = @transform_2, window_bounds = array<i64: 8, 128>}]} {
    %c0_i32 = arith.constant 0 : i32
    %0 = arith.cmpi eq, %arg1, %c0_i32 : i32
    %1 = arith.extui %0 : i1 to i32
    %c0_i32_0 = arith.constant 0 : i32
    %2 = arith.cmpi ne, %1, %c0_i32_0 : i32
    scf.if %2 {
      %cst_12 = arith.constant 0.000000e+00 : f32
      %24 = vector.broadcast %cst_12 : f32 to vector<8x128xf32>
      %c0_13 = arith.constant 0 : index
      %c0_14 = arith.constant 0 : index
      %25 = vector.load %arg5[%c0_13, %c0_14] : memref<8x128xf32, #tpu.memory_space<vmem>>, vector<8x128xf32>
      tpu.vector_store %arg5[%c0_13, %c0_14], %24 {strides = array<i32>} : memref<8x128xf32, #tpu.memory_space<vmem>>, vector<8x128xf32>,
    } else {
    }
    %c0 = arith.constant 0 : index
    %c0_1 = arith.constant 0 : index
    %3 = vector.load %arg2[%c0, %c0_1] : memref<16x128xf32, #tpu.memory_space<vmem>>, vector<16x128xf32>
    %c0_2 = arith.constant 0 : index
    %c0_3 = arith.constant 0 : index
    %4 = vector.load %arg3[%c0_2, %c0_3] : memref<16x128xf32, #tpu.memory_space<vmem>>, vector<16x128xf32>
    %5 = arith.subf %3, %4 : vector<16x128xf32>
    %6 = arith.mulf %5, %5 : vector<16x128xf32>
    %c1_i32 = arith.constant 1 : i32
    %7 = arith.muli %arg0, %c1_i32 : i32
    %8 = arith.addi %7, %arg1 : i32
    %c16_i32 = arith.constant 16 : i32
    %9 = arith.muli %8, %c16_i32 : i32
    %c16_i32_4 = arith.constant 16 : i32
    %10 = arith.subi %c16_i32_4, %9 : i32
    %11 = tpu.iota {dimensions = array<i32: 0>} : vector<16x128xi32>
    %12 = vector.broadcast %10 : i32 to vector<16x128xi32>
    %13 = arith.cmpi slt, %11, %12 : vector<16x128xi32>
    %cst = arith.constant 0.000000e+00 : f32
    %14 = vector.broadcast %cst : f32 to vector<16x128xf32>
    %15 = arith.select %13, %6, %14 : vector<16x128xi1>, vector<16x128xf32>
    %c0_5 = arith.constant 0 : index
    %c0_6 = arith.constant 0 : index
    %16 = vector.load %arg5[%c0_5, %c0_6] : memref<8x128xf32, #tpu.memory_space<vmem>>, vector<8x128xf32>
    %17 = vector.shape_cast %15 : vector<16x128xf32> to vector<2x8x128xf32>
    %cst_7 = arith.constant dense<0.000000e+00> : vector<8x128xf32>
    %18 = vector.multi_reduction <add>, %17, %cst_7 [0] : vector<2x8x128xf32> to vector<8x128xf32>
    %19 = arith.addf %16, %18 : vector<8x128xf32>
    %c0_8 = arith.constant 0 : index
    %c0_9 = arith.constant 0 : index
    %20 = vector.load %arg5[%c0_8, %c0_9] : memref<8x128xf32, #tpu.memory_space<vmem>>, vector<8x128xf32>
    tpu.vector_store %arg5[%c0_8, %c0_9], %19 {strides = array<i32>} : memref<8x128xf32, #tpu.memory_space<vmem>>, vector<8x128xf32>,
    %c0_i32_10 = arith.constant 0 : i32
    %21 = arith.cmpi eq, %arg1, %c0_i32_10 : i32
    %22 = arith.extui %21 : i1 to i32
    %c0_i32_11 = arith.constant 0 : i32
    %23 = arith.cmpi ne, %22, %c0_i32_11 : i32
    scf.if %23 {
      %c0_12 = arith.constant 0 : index
      %c0_13 = arith.constant 0 : index
      %24 = vector.load %arg5[%c0_12, %c0_13] : memref<8x128xf32, #tpu.memory_space<vmem>>, vector<8x128xf32>
      %c0_14 = arith.constant 0 : index
      %c0_15 = arith.constant 0 : index
      %25 = vector.load %arg4[%c0_14, %c0_15] : memref<8x128xf32, #tpu.memory_space<vmem>>, vector<8x128xf32>
      tpu.vector_store %arg4[%c0_14, %c0_15], %24 {strides = array<i32>} : memref<8x128xf32, #tpu.memory_space<vmem>>, vector<8x128xf32>,
    } else {
    }
    return
  }
  func.func @transform_0(%arg0: i32, %arg1: i32) -> (i32, i32) {
    %c1_i32 = arith.constant 1 : i32
    %0 = arith.muli %arg0, %c1_i32 : i32
    %1 = arith.addi %0, %arg1 : i32
    %c0_i32 = arith.constant 0 : i32
    %2 = arith.minsi %1, %c0_i32 : i32
    %c0_i32_0 = arith.constant 0 : i32
    %c0_i32_1 = arith.constant 0 : i32
    return %2, %c0_i32_0 : i32, i32
  }
  func.func @transform_1(%arg0: i32, %arg1: i32) -> (i32, i32) {
    %c1_i32 = arith.constant 1 : i32
    %0 = arith.muli %arg0, %c1_i32 : i32
    %1 = arith.addi %0, %arg1 : i32
    %c0_i32 = arith.constant 0 : i32
    %2 = arith.minsi %1, %c0_i32 : i32
    %c0_i32_0 = arith.constant 0 : i32
    %c0_i32_1 = arith.constant 0 : i32
    return %2, %c0_i32_0 : i32, i32
  }
  func.func @transform_2(%arg0: i32, %arg1: i32) -> (i32, i32) {
    %c0_i32 = arith.constant 0 : i32
    %c0_i32_0 = arith.constant 0 : i32
    return %arg0, %c0_i32 : i32, i32
  }
}

</mosaic_0001>

<bundles_post_ra>
// kernel: tpu_custom_call.1
= control target key start
LH: loop header
LB: loop body
LE: loop exit
PB: predicated region body
PF: predicated region fallthrough
CT: control target
= control target key end

     0   :  { %7 = vsyncpa [#allocation4], 0  ;;  %s864_s0 = inlined_call_operand.hbm [shape: f32[16,128], index: 0, kind: input, shape index: {}]   ;;  %s865_s1 = inlined_call_operand.hbm [shape: f32[16,128], index: 1, kind: input, shape index: {}]   ;;  %s866_s2 = inlined_call_operand.hbm [shape: f32[16,128], index: 2, kind: output, shape index: {}]  }
   0x1   :  { %9 = vsyncpa [#allocation4 + $0x1], 0 }
   0x2   :  { %10 = vsyncpa [#allocation7], 0 }
   0x3   :  { %12 = vsyncpa [#allocation7 + $0x1], 0 }
   0x4   :  { %13 = vsyncpa [#allocation5], 0 }
   0x5   :  { %15 = vsyncpa [#allocation5 + $0x1], 0  ;;  %s685_s9 = smov 0   ;;  %s687_s10 = smov 0  }
   0x6   :  { %s689_s11 = smov 0   ;;  %s691_s12 = smov 0  }
   0x7   :  { %s693_s13 = smov 0   ;;  %s695_s14 = smov 0  }
   0x8   :  { %s697_s15 = smov 0   ;;  %s699_s16 = smov 0  }
   0x9 LB: > { %s388_s17 = sadd.s32 4294967295, %s663_s16   ;;  %s389_s18 = sadd.s32 4294967294, %s663_s16   ;;  %s663_s16 = sphi %s699_s16, %s21_s16   ;;  %s659_s15 = sphi %s697_s15, %s885_s15   ;;  %s655_s14 = sphi %s695_s14, %s884_s14   ;;  %s651_s13 = sphi %s693_s13, %s854_s13   ;;  %s647_s12 = sphi %s691_s12, %s883_s12   ;;  %s643_s11 = sphi %s689_s11, %s882_s11   ;;  %s639_s10 = sphi %s687_s10, %s881_s10   ;;  %s635_s9 = sphi %s685_s9, %s880_s9  }
   0xa   : > { %s33_s19 = sadd.s32 1, %s659_s15  ;;  %p632_p1 = scmp.ne.s32.totalorder %s651_s13, 0 }
   0xb   : > { %p35_p0 = scmp.ge.s32.totalorder %s33_s19, 2  ;;  %p54_p2 = scmp.eq.s32.totalorder %s663_s16, 0 }
   0xc   : > { %p59_p3 = scmp.ne.s32.totalorder %s651_s13, %s647_s12  ;;  %p60_p5 = scmp.eq.s32.totalorder %s388_s17, 0 }
   0xd   : > { %s887_s19 = smov (%p35_p0, %s33_s19), 0  ;;  %p731_p4 = por %p632_p1, %p54_p2 }
   0xe   : > { %p735_p6 = por %p60_p5, %p59_p3  ;;  %s101_s22 = ssub.s32 %s659_s15, %s887_s19 }
   0xf   : > { %p102_p7 = scmp.eq.s32.totalorder %s101_s22, 0  ;;  %s104_s23 = sadd.s32 1, %s643_s11 }
  0x10   : > { %s870_s21 = scalar_select %p735_p6, 1, 0 }
  0x11   : > { %s743_s24 = scalar_select %p102_p7, %s643_s11, %s104_s23  }
  0x12   : > { %p114_p8 = scmp.ne.s32.totalorder %s643_s11, %s639_s10  ;;  %p115_p9 = scmp.eq.s32.totalorder %s388_s17, 1 }
  0x13   : > { %p120_p10 = scmp.ne.s32.totalorder %s639_s10, %s635_s9  ;;  %p121_p11 = scmp.eq.s32.totalorder %s389_s18, 1 }
  0x14   : > { %p749_p12 = por %p115_p9, %p114_p8  ;;  %p426_p1 = scmp.lt.s32.totalorder %s663_s16, 2 }
  0x15   : > { %p754_p0 = por %p121_p11, %p120_p10  ;;  %s665_s27 = smov [#allocation3]  }
  0x16   : > { %s871_s25 = scalar_select %p749_p12, 1, 0 }
  0x17   : > { %s872_s26 = scalar_select %p754_p0, 1, 0 }
  0x18   : > { %s155_s28 = sshll.u32 %s665_s27, 4  ;;  %p761_p2 = pnand %p426_p1, %p731_p4  ;;  %s156_s28 = int_to_ptr.vmem [resolvable:$true] %s155_s28 }
  0x19   : > { %s502_s4 = scalar_lea.hbm %s864_s0, 256 }
  0x1a   : > { %p503_p3 = scmp.ne.s32.totalorder %s864_s0, %s502_s4  ;;  %p504_p5 = pneg %p761_p2 }
  0x1b   : > { %p509_p8 = scmp.lt.s32.totalorder %s502_s4, %s502_s4 }
  0x1c   : > { %p505_p7 = pnand %p504_p5, %p503_p3 }
  0x1e   : > { %p506_p4 = pneg %p505_p7 }
  0x20   : > { %p511_p9 = pnand %p509_p8, %p506_p4 }
  0x22   : > { %514 = shalt.err (!%p511_p9)
}
  0x23   : > { %s515_s7 = scalar_lea.vmem %s156_s28, 256  ;;  %s522_s8 = scalar_lea.vmem %s156_s28, 512 }
  0x24   : > { %p516_p10 = scmp.ne.s32.totalorder %s156_s28, %s515_s7  ;;  %p523_p13 = scmp.lt.s32.totalorder %s156_s28, %s156_s28 }
  0x25   : > { %p524_p0 = scmp.lt.s32.totalorder %s522_s8, %s515_s7 }
  0x26   : > { %p518_p11 = pnand %p516_p10, %p504_p5 }
  0x27   : > { %p525_p12 = por %p524_p0, %p523_p13 }
  0x28   : > { %p519_p1 = pneg %p518_p11 }
  0x2a   : > { %p526_p6 = pnand %p525_p12, %p519_p1 }
  0x2c   : > { %529 = shalt.err (!%p526_p6)
}
  0x2d   : > { %s666_s12 = smov 128   ;;  %s667_s17 = smov 8  }
  0x2e   : > { %418 = dma.hbm_to_vmem [thread:$0]  (!%p761_p2), %s864_s0, 256, %s156_s28, [#allocation4], %s666_s12, %s666_s12, %s667_s17  }
  0x2f   : > { %p398_p3 = scmp.ge.s32.totalorder %s663_s16, 1  ;;  %p187_p7 = scmp.lt.s32.totalorder %s663_s16, 3 }
  0x30   : > { %s668_s23 = smov [#allocation6]   ;;  %s530_s4 = scalar_lea.hbm %s865_s1, 256 }
  0x31   : > { %p786_p4 = pnand %p398_p3, %p187_p7  ;;  %s179_s27 = sshll.u32 %s668_s23, 4  ;;  %s180_s27 = int_to_ptr.vmem [resolvable:$true] %s179_s27 }
  0x32   : > { %p531_p6 = scmp.ne.s32.totalorder %s865_s1, %s530_s4  ;;  %p537_p0 = scmp.lt.s32.totalorder %s530_s4, %s530_s4 }
  0x33   : > { %s874_s22 = scalar_select %p786_p4, 1, 0 }
  0x34   : > { %p533_p12 = pnand %p531_p6, %p504_p5 }
  0x36   : > { %p534_p13 = pneg %p533_p12 }
  0x38   : > { %p539_p8 = pnand %p537_p0, %p534_p13 }
  0x3a   : > { %542 = shalt.err (!%p539_p8)
}
  0x3b   : > { %s543_s28 = scalar_lea.vmem %s180_s27, 256  ;;  %s550_s7 = scalar_lea.vmem %s180_s27, 512 }
  0x3c   : > { %p544_p9 = scmp.ne.s32.totalorder %s180_s27, %s543_s28  ;;  %p551_p1 = scmp.lt.s32.totalorder %s180_s27, %s180_s27 }
  0x3d   : > { %p552_p3 = scmp.lt.s32.totalorder %s550_s7, %s543_s28 }
  0x3e   : > { %p546_p10 = pnand %p544_p9, %p504_p5 }
  0x3f   : > { %p553_p7 = por %p552_p3, %p551_p1 }
  0x40   : > { %p547_p11 = pneg %p546_p10 }
  0x42   : > { %p554_p4 = pnand %p553_p7, %p547_p11 }
  0x44   : > { %557 = shalt.err (!%p554_p4)
}
  0x45   : > { %421 = dma.hbm_to_vmem [thread:$0]  (!%p761_p2), %s865_s1, 256, %s180_s27, [#allocation7], %s666_s12, %s666_s12, %s667_s17  }
  0x46   : > { %p875_p6 = scmp.ne.s32.totalorder %s874_s22, 0 }
  0x47   : > { %s193_s20 = sand.u32 (!%p875_p6), 1, %s651_s13   ;;  %p876_p5 = scmp.ne.s32.totalorder (!%p875_p6), %s870_s21, 0 }
  0x48   : > { %191 = sbr.rel (%p875_p6) target bundleno = 107 (0x6b), region = 28  ;;  %s399_s23 = sshll.u32 (!%p875_p6), %s193_s20, 4 }
  0x49   : > { %s194_s30 = scalar_lea.sflag (!%p875_p6), [#allocation4], %s193_s20  ;;  %s197_s3 = scalar_lea.vmem (!%p875_p6), [#allocation3], %s399_s23 }
  0x4d   : > { %621 = dma.done.wait (%p876_p5), %s194_s30, 256  }
  0x4e   : > { %623 = vsyncadd (%p876_p5), %s194_s30, 4294967040  ;;  %s203_s29 = scalar_lea.sflag [#allocation7], %s193_s20  ;;  %s206_s4 = scalar_lea.vmem [#allocation6], %s399_s23 }
  0x4f   : > { %625 = dma.done.wait (%p876_p5), %s203_s29, 256  }
  0x50   : > { %627 = vsyncadd (%p876_p5), %s203_s29, 4294967040  ;;  %s402_s12 = sshll.u32 %s655_s14, 4  ;;  %v256_v0 = vlaneseq  ;;  %s229_s17 = sand.u32 1, %s639_s10   ;;  %v245_v4 = vld [vmem:[%s197_s3] sm:$0xff]  ;;  %v246_v5 = vld [vmem:[%s197_s3 + $0x8] sm:$0xff] }
  0x51   : > { %s255_s22 = ssub.s32 16, %s402_s12  ;;  %s401_s27 = sshll.u32 %s229_s17, 3  ;;  %v247_v6 = vld [vmem:[%s206_s4] sm:$0xff]  ;;  %v248_v7 = vld [vmem:[%s206_s4 + $0x8] sm:$0xff] }
  0x52   : > { %v257_v1 = vshrl.u32 %v256_v0, 7  ;;  %v259_v3 = vstv %s255_s22  ;;  %v249_v8 = vsub.f32 %v245_v4, %v247_v6  ;;  %v250_v9 = vsub.f32 %v246_v5, %v248_v7  ;;  %s231_s21 = scalar_lea.vmem [#allocation8], %s401_s27  ;;  %s404_s6 = sshll.u32 %s655_s14, 7 }
  0x53   : > { %s287_s5 = sshll.u32 %s231_s21, 4  ;;  %s285_s8 = scalar_lea.hbm %s866_s2, %s404_s6  ;;  %s288_s5 = int_to_ptr.vmem [resolvable:$true] %s287_s5 }
  0x54   : > { %v258_v2 = vadd.s32 8, %v257_v1  ;;  %vm260_vm0 = vcmp.lt.s32.totalorder %v257_v1, %v259_v3  ;;  %v251_v10 = vmul.f32 %v249_v8, %v249_v8  ;;  %v252_v11 = vmul.f32 %v250_v9, %v250_v9  ;;  %s274_s18 = scalar_lea.sflag [#allocation5], %s229_s17  ;;  %s558_s20 = scalar_lea.vmem %s288_s5, 128 }
  0x55   : > { %p559_p2 = scmp.ne.s32.totalorder %s288_s5, %s558_s20  ;;  %p877_p4 = scmp.ne.s32.totalorder %s871_s25, 0 }
  0x56   : > { %vm261_vm1 = vcmp.lt.s32.totalorder %v258_v2, %v259_v3  ;;  %v262_v12 = vsel %vm260_vm0, %v251_v10, 0.0  ;;  %s669_s23 = smov [#allocation8]  }
  0x57   : > { %v263_v13 = vsel %vm261_vm1, %v252_v11, 0.0  ;;  %p560_p12 = pnand %p559_p2, %p877_p4  ;;  %s562_s30 = sshll.u32 %s669_s23, 4  ;;  %s563_s30 = int_to_ptr.vmem [resolvable:$false] %s562_s30 }
  0x58   : > { %v265_v14 = vadd.f32 %v263_v13, %v262_v12  ;;  %s564_s3 = scalar_lea.vmem %s563_s30, 256  ;;  %p565_p0 = scmp.lt.s32.totalorder %s288_s5, %s563_s30 }
  0x59   : > { %p561_p13 = pneg %p560_p12  ;;  %p566_p8 = scmp.lt.s32.totalorder %s564_s3, %s558_s20 }
  0x5a   : > { %272 = vst [vmem:[%s231_s21] sm:$0xff] %v265_v14 }
  0x5b   : > { %p567_p9 = por %p566_p8, %p565_p0 }
  0x5d   : > { %p568_p10 = pnand %p567_p9, %p561_p13 }
  0x5f   : > { %571 = shalt.err (!%p568_p10)
}
  0x60   : > { %s572_s14 = scalar_lea.hbm %s285_s8, 128  ;;  %s576_s12 = scalar_lea.hbm %s866_s2, 256 }
  0x61   : > { %p573_p11 = scmp.ne.s32.totalorder %s285_s8, %s572_s14  ;;  %p577_p7 = scmp.lt.s32.totalorder %s285_s8, %s866_s2 }
  0x62   : > { %p578_p6 = scmp.lt.s32.totalorder %s576_s12, %s572_s14 }
  0x63   : > { %p574_p1 = pnand %p573_p11, %p877_p4 }
  0x64   : > { %p579_p5 = por %p578_p6, %p577_p7 }
  0x65   : > { %p575_p3 = pneg %p574_p1 }
  0x67   : > { %p580_p2 = pnand %p579_p5, %p575_p3 }
  0x69   : > { %583 = shalt.err (!%p580_p2)
}
  0x6a   : > { %413 = dma.vmem_to_hbm [thread:$0]  (%p877_p4), %s288_s5, 128, %s285_s8, %s274_s18  }
  0x6b PF: > { %s299_s27 = sand.u32 1, %s635_s9   ;;  %p878_p12 = scmp.ne.s32.totalorder %s872_s26, 0 }
  0x6c   : > { %p879_p13 = scmp.ge.s32.totalorder %s663_s16, 2  ;;  %s300_s21 = scalar_lea.sflag [#allocation5], %s299_s27 }
  0x6e   : > { %p423_p0 = pnand %p879_p13, %p878_p12 }
  0x70   : > { %p424_p8 = pneg %p423_p0 }
  0x72   : > { %629 = dma.done.wait (%p424_p8), %s300_s21, 128  }
  0x73   : > { %631 = vsyncadd (%p424_p8), %s300_s21, 4294967168  ;;  %s21_s16 = sadd.s32 1, %s663_s16   ;;  %s880_s9 = smov %s639_s10 }
  0x74   : > { %p18_p9 = scmp.ge.s32.totalorder %s21_s16, 4   ;;  %s881_s10 = smov %s643_s11 }
  0x75   : > { %s882_s11 = smov %s743_s24  ;;  %s883_s12 = smov %s651_s13 }
  0x76   : > { %s854_s13 = smov 0   ;;  %s884_s14 = smov %s659_s15 }
  0x77   : > { %s885_s15 = smov %s887_s19  ;;  %20 = sbr.rel (!%p18_p9) target bundleno = 9 (0x9), region = 94 }
  0x7c   :  { %305 = vsyncpa [#allocation4], 1 }
  0x7d   :  { %307 = vsyncpa [#allocation4 + $0x1], 1 }
  0x7e   :  { %308 = vsyncpa [#allocation7], 1 }
  0x7f   :  { %310 = vsyncpa [#allocation7 + $0x1], 1 }
  0x80   :  { %311 = vsyncpa [#allocation5], 1 }
  0x81   :  { %313 = vsyncpa [#allocation5 + $0x1], 1 }

</bundles_post_ra>
